<compile_context>
chip_gen: v6e
topology: v6e:2x2x1
jax: 0.10.0
libtpu: 0.0.40
codegen_flags: <defaults>
</compile_context>

<pallas_src>
import math

import jax
import jax.numpy as jnp
from jax.experimental import pallas as pl
from jax.experimental.pallas import tpu as pltpu

HIDDEN = 256
OUT_LANES = 128  # lane-dense output slab width


def _round_up(n, m):
    return ((n + m - 1) // m) * m


def _critic_fused_kernel(x_ref, w1_ref, w23_ref, vp_ref, o_ref):
    """Single invocation, both Q branches unrolled.

    x_ref   : (batch_pad, k_pad)     f32  shared (padded) input
    w1_ref  : (2, k_pad, 256)        f32  layer-1 weights (both branches)
    w23_ref : (2, 2, 256, 256)       f32  layer-2 / layer-3 weights
    vp_ref  : (2, 8, 256)            f32  rows 0-2: hidden biases,
                                          row 3: head weight row,
                                          row 4 lane 0: head bias, rest pad
    o_ref   : (batch_pad, 128)       f32  lane 0 = q1, lane 1 = q2
    """
    x = x_ref[...]          # (Bp, Kp) f32, loaded once, shared by both chains
    vp = vp_ref[...]        # (2, 8, H) f32

    qs = []
    for br in range(2):     # static unroll: two independent chains interleave
        h = jnp.dot(x, w1_ref[br],
                    preferred_element_type=jnp.float32) + vp[br, 0:1, :]
        h = jnp.maximum(h, 0.0)

        h = jnp.dot(h, w23_ref[br, 0],
                    preferred_element_type=jnp.float32) + vp[br, 1:2, :]
        h = jnp.maximum(h, 0.0)

        h = jnp.dot(h, w23_ref[br, 1],
                    preferred_element_type=jnp.float32) + vp[br, 2:3, :]
        h = jnp.maximum(h, 0.0)

        # N=1 head as VPU multiply + XLU row reduce (no degenerate MXU pass).
        q = (jnp.sum(h * vp[br, 3:4, :], axis=-1, keepdims=True)
             + vp[br, 4:5, 0:1])
        qs.append(q)        # (Bp, 1)

    # Lane-dense store: q1 in lane 0, q2 in lane 1, zeros elsewhere.
    lane = jax.lax.broadcasted_iota(jnp.int32, o_ref.shape, 1)
    o_ref[...] = jnp.where(lane == 0, qs[0],
                           jnp.where(lane == 1, qs[1], 0.0))


def _init_linear(key, fan_in, fan_out):
    """PyTorch nn.Linear init: U(-1/sqrt(fan_in), 1/sqrt(fan_in))."""
    kw, kb = jax.random.split(key)
    bound = 1.0 / math.sqrt(fan_in)
    w = jax.random.uniform(kw, (fan_in, fan_out), jnp.float32, -bound, bound)
    b = jax.random.uniform(kb, (fan_out,), jnp.float32, -bound, bound)
    return w, b


def init_critic_params(key, state_dim, goal_dim, action_dim, hidden=HIDDEN):
    """Returns (packed kernel params, raw f32 per-layer params)."""
    input_dim = state_dim + goal_dim + action_dim
    k_pad = _round_up(input_dim, 8)          # aligned K for layer-1 matmul
    keys = jax.random.split(key, 8)

    raw = {}
    names = ("fc1_1", "fc1_2", "fc1_3", "q1_out",
             "fc2_1", "fc2_2", "fc2_3", "q2_out")
    dims = ((input_dim, hidden), (hidden, hidden),
            (hidden, hidden), (hidden, 1)) * 2
    for k, name, (fi, fo) in zip(keys, names, dims):
        raw[name] = _init_linear(k, fi, fo)

    w1_pack, w23_pack, vrows = [], [], []
    for br in ("1", "2"):
        w1, b1 = raw[f"fc{br}_1"]
        w2, b2 = raw[f"fc{br}_2"]
        w3, b3 = raw[f"fc{br}_3"]
        wq, bq = raw[f"q{br}_out"]
        # zero-pad the K (fan_in) axis once at pack time
        w1_pack.append(jnp.pad(w1, ((0, k_pad - input_dim), (0, 0))))
        w23_pack.append(jnp.stack([w2, w3]))
        vrows.append(jnp.stack([
            b1, b2, b3,
            wq[:, 0],                                        # head weight row
            jnp.zeros((hidden,), jnp.float32).at[0].set(bq[0]),  # head bias
            jnp.zeros((hidden,), jnp.float32),
            jnp.zeros((hidden,), jnp.float32),
            jnp.zeros((hidden,), jnp.float32),
        ]))

    packed = {
        "w1": jnp.stack(w1_pack),      # (2, k_pad, H)   f32
        "w23": jnp.stack(w23_pack),    # (2, 2, H, H)    f32
        "vpack": jnp.stack(vrows),     # (2, 8, H)       f32
    }
    return packed, raw


@jax.jit
def critic_forward(packed, state, goal, action):
    x = jnp.concatenate([state, goal, action], axis=1).astype(jnp.float32)
    batch, input_dim = x.shape
    w1, w23, vpack = packed["w1"], packed["w23"], packed["vpack"]

    k_pad = w1.shape[1]
    b_pad = _round_up(batch, 8)
    x = jnp.pad(x, ((0, b_pad - batch), (0, k_pad - input_dim)))

    flops = int(2 * (2 * b_pad * k_pad * HIDDEN
                     + 2 * (2 * b_pad * HIDDEN * HIDDEN))
                + 2 * (2 * b_pad * HIDDEN))
    bytes_accessed = int((x.size + w1.size + w23.size + vpack.size
                          + b_pad * OUT_LANES) * 4)

    vmem_spec = pl.BlockSpec(memory_space=pltpu.MemorySpace.VMEM)
    out = pl.pallas_call(
        _critic_fused_kernel,
        out_shape=jax.ShapeDtypeStruct((b_pad, OUT_LANES), jnp.float32),
        in_specs=[vmem_spec, vmem_spec, vmem_spec, vmem_spec],
        out_specs=vmem_spec,
        cost_estimate=pl.CostEstimate(flops=flops, transcendentals=0,
                                      bytes_accessed=bytes_accessed),
    )(x, w1, w23, vpack)

    q1 = out[:batch, 0:1]
    q2 = out[:batch, 1:2]
    return q1, q2


def critic_reference_f32(raw, state, goal, action):
    """Pure-JAX f32 reference with the original PyTorch semantics."""
    x = jnp.concatenate([state, goal, action], axis=1).astype(jnp.float32)

    def branch(names):
        h = x
        for name in names[:-1]:
            w, b = raw[name]
            h = jnp.maximum(h @ w + b[None, :], 0.0)
        w, b = raw[names[-1]]
        return h @ w + b[None, :]

    q1 = branch(["fc1_1", "fc1_2", "fc1_3", "q1_out"])
    q2 = branch(["fc2_1", "fc2_2", "fc2_3", "q2_out"])
    return q1, q2


if __name__ == "__main__":
    key = jax.random.PRNGKey(0)
    k_params, k_s, k_g, k_a = jax.random.split(key, 4)

    batch = 8
    state_dim, goal_dim, action_dim = 16, 8, 4

    packed, raw = init_critic_params(k_params, state_dim, goal_dim, action_dim)
    state = jax.random.normal(k_s, (batch, state_dim), jnp.float32)
    goal = jax.random.normal(k_g, (batch, goal_dim), jnp.float32)
    action = jax.random.normal(k_a, (batch, action_dim), jnp.float32)

    q1, q2 = critic_forward(packed, state, goal, action)
    q1 = jax.block_until_ready(q1)
    q2 = jax.block_until_ready(q2)
    assert q1.shape == (batch, 1) and q2.shape == (batch, 1)

    # f32 PyTorch-semantics reference (kernel is f32 end-to-end now).
    r1, r2 = critic_reference_f32(raw, state, goal, action)
    assert jnp.allclose(q1, r1, atol=2e-2, rtol=2e-2)
    assert jnp.allclose(q2, r2, atol=2e-2, rtol=2e-2)

    print("KERNEL_OK")
</pallas_src>

<mosaic_0001>
module attributes {stable_mosaic.version = 11 : i64} {
  func.func @_critic_fused_kernel(%arg0: memref<8x32xf32, #tpu.memory_space<vmem>>, %arg1: memref<2x32x256xf32, #tpu.memory_space<vmem>>, %arg2: memref<2x2x256x256xf32, #tpu.memory_space<vmem>>, %arg3: memref<2x8x256xf32, #tpu.memory_space<vmem>>, %arg4: memref<8x128xf32, #tpu.memory_space<vmem>>) attributes {dimension_semantics = [], scalar_prefetch = 0 : i64, scratch_operands = 0 : i64, tpu.core_type = #tpu.core_type<tc>} {
    %c0 = arith.constant 0 : index
    %c0_0 = arith.constant 0 : index
    %0 = vector.load %arg0[%c0, %c0_0] : memref<8x32xf32, #tpu.memory_space<vmem>>, vector<8x32xf32>
    %c0_1 = arith.constant 0 : index
    %c0_2 = arith.constant 0 : index
    %c0_3 = arith.constant 0 : index
    %1 = vector.load %arg3[%c0_1, %c0_2, %c0_3] : memref<2x8x256xf32, #tpu.memory_space<vmem>>, vector<2x8x256xf32>
    %c0_4 = arith.constant 0 : index
    %c0_5 = arith.constant 0 : index
    %c0_6 = arith.constant 0 : index
    %2 = vector.load %arg1[%c0_4, %c0_5, %c0_6] : memref<2x32x256xf32, #tpu.memory_space<vmem>>, vector<1x32x256xf32>
    %3 = vector.shape_cast %2 : vector<1x32x256xf32> to vector<32x256xf32>
    %cst = arith.constant dense<0.000000e+00> : vector<8x256xf32>
    %4 = tpu.matmul %0, %3, %cst {dimension_numbers = #tpu.dot_dimension_numbers<[1], [0], [0], [1], [0, 0, 1, 1], [], []>} : vector<8x32xf32>, vector<32x256xf32>, vector<8x256xf32> -> vector<8x256xf32>
    %5 = vector.extract_strided_slice %1 {offsets = [0, 0, 0], sizes = [1, 1, 256], strides = [1, 1, 1]} : vector<2x8x256xf32> to vector<1x1x256xf32>
    %6 = vector.shape_cast %5 : vector<1x1x256xf32> to vector<1x256xf32>
    %7 = vector.broadcast %6 : vector<1x256xf32> to vector<8x256xf32>
    %8 = arith.addf %4, %7 : vector<8x256xf32>
    %cst_7 = arith.constant 0.000000e+00 : f32
    %9 = vector.broadcast %cst_7 : f32 to vector<8x256xf32>
    %10 = arith.maximumf %8, %9 : vector<8x256xf32>
    %c0_8 = arith.constant 0 : index
    %c0_9 = arith.constant 0 : index
    %c0_10 = arith.constant 0 : index
    %c0_11 = arith.constant 0 : index
    %11 = vector.load %arg2[%c0_8, %c0_9, %c0_10, %c0_11] : memref<2x2x256x256xf32, #tpu.memory_space<vmem>>, vector<1x1x256x256xf32>
    %12 = vector.shape_cast %11 : vector<1x1x256x256xf32> to vector<256x256xf32>
    %cst_12 = arith.constant dense<0.000000e+00> : vector<8x256xf32>
    %13 = tpu.matmul %10, %12, %cst_12 {dimension_numbers = #tpu.dot_dimension_numbers<[1], [0], [0], [1], [0, 0, 1, 1], [], []>} : vector<8x256xf32>, vector<256x256xf32>, vector<8x256xf32> -> vector<8x256xf32>
    %14 = vector.extract_strided_slice %1 {offsets = [0, 1, 0], sizes = [1, 1, 256], strides = [1, 1, 1]} : vector<2x8x256xf32> to vector<1x1x256xf32>
    %15 = vector.shape_cast %14 : vector<1x1x256xf32> to vector<1x256xf32>
    %16 = vector.broadcast %15 : vector<1x256xf32> to vector<8x256xf32>
    %17 = arith.addf %13, %16 : vector<8x256xf32>
    %cst_13 = arith.constant 0.000000e+00 : f32
    %18 = vector.broadcast %cst_13 : f32 to vector<8x256xf32>
    %19 = arith.maximumf %17, %18 : vector<8x256xf32>
    %c0_14 = arith.constant 0 : index
    %c1 = arith.constant 1 : index
    %c0_15 = arith.constant 0 : index
    %c0_16 = arith.constant 0 : index
    %20 = vector.load %arg2[%c0_14, %c1, %c0_15, %c0_16] : memref<2x2x256x256xf32, #tpu.memory_space<vmem>>, vector<1x1x256x256xf32>
    %21 = vector.shape_cast %20 : vector<1x1x256x256xf32> to vector<256x256xf32>
    %cst_17 = arith.constant dense<0.000000e+00> : vector<8x256xf32>
    %22 = tpu.matmul %19, %21, %cst_17 {dimension_numbers = #tpu.dot_dimension_numbers<[1], [0], [0], [1], [0, 0, 1, 1], [], []>} : vector<8x256xf32>, vector<256x256xf32>, vector<8x256xf32> -> vector<8x256xf32>
    %23 = vector.extract_strided_slice %1 {offsets = [0, 2, 0], sizes = [1, 1, 256], strides = [1, 1, 1]} : vector<2x8x256xf32> to vector<1x1x256xf32>
    %24 = vector.shape_cast %23 : vector<1x1x256xf32> to vector<1x256xf32>
    %25 = vector.broadcast %24 : vector<1x256xf32> to vector<8x256xf32>
    %26 = arith.addf %22, %25 : vector<8x256xf32>
    %cst_18 = arith.constant 0.000000e+00 : f32
    %27 = vector.broadcast %cst_18 : f32 to vector<8x256xf32>
    %28 = arith.maximumf %26, %27 : vector<8x256xf32>
    %29 = vector.extract_strided_slice %1 {offsets = [0, 3, 0], sizes = [1, 1, 256], strides = [1, 1, 1]} : vector<2x8x256xf32> to vector<1x1x256xf32>
    %30 = vector.shape_cast %29 : vector<1x1x256xf32> to vector<1x256xf32>
    %31 = vector.broadcast %30 : vector<1x256xf32> to vector<8x256xf32>
    %32 = arith.mulf %28, %31 : vector<8x256xf32>
    %cst_19 = arith.constant dense<0.000000e+00> : vector<8xf32>
    %33 = vector.multi_reduction <add>, %32, %cst_19 [1] : vector<8x256xf32> to vector<8xf32>
    %34 = vector.shape_cast %33 : vector<8xf32> to vector<8x1xf32>
    %35 = vector.extract_strided_slice %1 {offsets = [0, 4, 0], sizes = [1, 1, 1], strides = [1, 1, 1]} : vector<2x8x256xf32> to vector<1x1x1xf32>
    %36 = vector.shape_cast %35 : vector<1x1x1xf32> to vector<1x1xf32>
    %37 = vector.broadcast %36 : vector<1x1xf32> to vector<8x1xf32>
    %38 = arith.addf %34, %37 : vector<8x1xf32>
    %c1_20 = arith.constant 1 : index
    %c0_21 = arith.constant 0 : index
    %c0_22 = arith.constant 0 : index
    %39 = vector.load %arg1[%c1_20, %c0_21, %c0_22] : memref<2x32x256xf32, #tpu.memory_space<vmem>>, vector<1x32x256xf32>
    %40 = vector.shape_cast %39 : vector<1x32x256xf32> to vector<32x256xf32>
    %cst_23 = arith.constant dense<0.000000e+00> : vector<8x256xf32>
    %41 = tpu.matmul %0, %40, %cst_23 {dimension_numbers = #tpu.dot_dimension_numbers<[1], [0], [0], [1], [0, 0, 1, 1], [], []>} : vector<8x32xf32>, vector<32x256xf32>, vector<8x256xf32> -> vector<8x256xf32>
    %42 = vector.extract_strided_slice %1 {offsets = [1, 0, 0], sizes = [1, 1, 256], strides = [1, 1, 1]} : vector<2x8x256xf32> to vector<1x1x256xf32>
    %43 = vector.shape_cast %42 : vector<1x1x256xf32> to vector<1x256xf32>
    %44 = vector.broadcast %43 : vector<1x256xf32> to vector<8x256xf32>
    %45 = arith.addf %41, %44 : vector<8x256xf32>
    %cst_24 = arith.constant 0.000000e+00 : f32
    %46 = vector.broadcast %cst_24 : f32 to vector<8x256xf32>
    %47 = arith.maximumf %45, %46 : vector<8x256xf32>
    %c1_25 = arith.constant 1 : index
    %c0_26 = arith.constant 0 : index
    %c0_27 = arith.constant 0 : index
    %c0_28 = arith.constant 0 : index
    %48 = vector.load %arg2[%c1_25, %c0_26, %c0_27, %c0_28] : memref<2x2x256x256xf32, #tpu.memory_space<vmem>>, vector<1x1x256x256xf32>
    %49 = vector.shape_cast %48 : vector<1x1x256x256xf32> to vector<256x256xf32>
    %cst_29 = arith.constant dense<0.000000e+00> : vector<8x256xf32>
    %50 = tpu.matmul %47, %49, %cst_29 {dimension_numbers = #tpu.dot_dimension_numbers<[1], [0], [0], [1], [0, 0, 1, 1], [], []>} : vector<8x256xf32>, vector<256x256xf32>, vector<8x256xf32> -> vector<8x256xf32>
    %51 = vector.extract_strided_slice %1 {offsets = [1, 1, 0], sizes = [1, 1, 256], strides = [1, 1, 1]} : vector<2x8x256xf32> to vector<1x1x256xf32>
    %52 = vector.shape_cast %51 : vector<1x1x256xf32> to vector<1x256xf32>
    %53 = vector.broadcast %52 : vector<1x256xf32> to vector<8x256xf32>
    %54 = arith.addf %50, %53 : vector<8x256xf32>
    %cst_30 = arith.constant 0.000000e+00 : f32
    %55 = vector.broadcast %cst_30 : f32 to vector<8x256xf32>
    %56 = arith.maximumf %54, %55 : vector<8x256xf32>
    %c1_31 = arith.constant 1 : index
    %c1_32 = arith.constant 1 : index
    %c0_33 = arith.constant 0 : index
    %c0_34 = arith.constant 0 : index
    %57 = vector.load %arg2[%c1_31, %c1_32, %c0_33, %c0_34] : memref<2x2x256x256xf32, #tpu.memory_space<vmem>>, vector<1x1x256x256xf32>
    %58 = vector.shape_cast %57 : vector<1x1x256x256xf32> to vector<256x256xf32>
    %cst_35 = arith.constant dense<0.000000e+00> : vector<8x256xf32>
    %59 = tpu.matmul %56, %58, %cst_35 {dimension_numbers = #tpu.dot_dimension_numbers<[1], [0], [0], [1], [0, 0, 1, 1], [], []>} : vector<8x256xf32>, vector<256x256xf32>, vector<8x256xf32> -> vector<8x256xf32>
    %60 = vector.extract_strided_slice %1 {offsets = [1, 2, 0], sizes = [1, 1, 256], strides = [1, 1, 1]} : vector<2x8x256xf32> to vector<1x1x256xf32>
    %61 = vector.shape_cast %60 : vector<1x1x256xf32> to vector<1x256xf32>
    %62 = vector.broadcast %61 : vector<1x256xf32> to vector<8x256xf32>
    %63 = arith.addf %59, %62 : vector<8x256xf32>
    %cst_36 = arith.constant 0.000000e+00 : f32
    %64 = vector.broadcast %cst_36 : f32 to vector<8x256xf32>
    %65 = arith.maximumf %63, %64 : vector<8x256xf32>
    %66 = vector.extract_strided_slice %1 {offsets = [1, 3, 0], sizes = [1, 1, 256], strides = [1, 1, 1]} : vector<2x8x256xf32> to vector<1x1x256xf32>
    %67 = vector.shape_cast %66 : vector<1x1x256xf32> to vector<1x256xf32>
    %68 = vector.broadcast %67 : vector<1x256xf32> to vector<8x256xf32>
    %69 = arith.mulf %65, %68 : vector<8x256xf32>
    %cst_37 = arith.constant dense<0.000000e+00> : vector<8xf32>
    %70 = vector.multi_reduction <add>, %69, %cst_37 [1] : vector<8x256xf32> to vector<8xf32>
    %71 = vector.shape_cast %70 : vector<8xf32> to vector<8x1xf32>
    %72 = vector.extract_strided_slice %1 {offsets = [1, 4, 0], sizes = [1, 1, 1], strides = [1, 1, 1]} : vector<2x8x256xf32> to vector<1x1x1xf32>
    %73 = vector.shape_cast %72 : vector<1x1x1xf32> to vector<1x1xf32>
    %74 = vector.broadcast %73 : vector<1x1xf32> to vector<8x1xf32>
    %75 = arith.addf %71, %74 : vector<8x1xf32>
    %76 = tpu.iota {dimensions = array<i32: 1>} : vector<8x128xi32>
    %c0_i32 = arith.constant 0 : i32
    %77 = vector.broadcast %c0_i32 : i32 to vector<8x128xi32>
    %78 = arith.cmpi eq, %76, %77 : vector<8x128xi32>
    %c1_i32 = arith.constant 1 : i32
    %79 = vector.broadcast %c1_i32 : i32 to vector<8x128xi32>
    %80 = arith.cmpi eq, %76, %79 : vector<8x128xi32>
    %cst_38 = arith.constant 0.000000e+00 : f32
    %81 = vector.shape_cast %75 : vector<8x1xf32> to vector<8x1xf32>
    %82 = vector.broadcast %81 : vector<8x1xf32> to vector<8x128xf32>
    %83 = vector.broadcast %cst_38 : f32 to vector<8x128xf32>
    %84 = arith.select %80, %82, %83 : vector<8x128xi1>, vector<8x128xf32>
    %85 = vector.shape_cast %38 : vector<8x1xf32> to vector<8x1xf32>
    %86 = vector.broadcast %85 : vector<8x1xf32> to vector<8x128xf32>
    %87 = arith.select %78, %86, %84 : vector<8x128xi1>, vector<8x128xf32>
    %c0_39 = arith.constant 0 : index
    %c0_40 = arith.constant 0 : index
    %88 = vector.load %arg4[%c0_39, %c0_40] : memref<8x128xf32, #tpu.memory_space<vmem>>, vector<8x128xf32>
    tpu.vector_store %arg4[%c0_39, %c0_40], %87 {strides = array<i32>} : memref<8x128xf32, #tpu.memory_space<vmem>>, vector<8x128xf32>,
    return
  }
}

</mosaic_0001>

<bundles_post_ra>
// kernel: critic_forward.1
= control target key start
LH: loop header
LB: loop body
LE: loop exit
PB: predicated region body
PF: predicated region fallthrough
CT: control target
= control target key end

     0   :  { %9 = vsyncpa [#allocation3], 0  ;;  %s1042_s0 = inlined_call_operand.vmem [shape: f32[8,32], index: 0, kind: input, shape index: {}]   ;;  %s1043_s1 = inlined_call_operand.hbm [shape: f32[2,32,256], index: 1, kind: input, shape index: {}]   ;;  %s1044_s2 = inlined_call_operand.hbm [shape: f32[2,2,256,256], index: 2, kind: input, shape index: {}]   ;;  %s1045_s3 = inlined_call_operand.vmem [shape: f32[2,8,256], index: 3, kind: input, shape index: {}]   ;;  %s1046_s4 = inlined_call_operand.vmem [shape: f32[8,128], index: 4, kind: output, shape index: {}]  }
   0x1   :  { %10 = vsyncpa [#allocation5], 0  ;;  %s929_s15 = smov [#allocation2]  }
   0x2   :  { %s18_s16 = sshll.u32 %s929_s15, 4  ;;  %s19_s16 = int_to_ptr.vmem [resolvable:$true] %s18_s16 }
   0x3   :  { %s893_s17 = scalar_lea.vmem %s19_s16, 2048  ;;  %p898_p1 = scmp.lt.s32.totalorder %s19_s16, %s19_s16 }
   0x4   :  { %p894_p0 = scmp.ne.s32.totalorder %s19_s16, %s893_s17  ;;  %p899_p2 = scmp.lt.s32.totalorder %s893_s17, %s893_s17 }
   0x6   :  { %p900_p3 = por %p899_p2, %p898_p1 }
   0x8   :  { %p901_p4 = pnand %p900_p3, %p894_p0 }
   0xa   :  { %904 = shalt.err (!%p901_p4)
}
   0xb   :  { %s930_s18 = smov 256   ;;  %s931_s19 = smov 16  }
   0xc   :  { %24 = dma.hbm_to_vmem [thread:$0]  %s1043_s1, 2048, %s19_s16, [#allocation3], %s930_s18, %s930_s18, %s931_s19  }
   0xd   :  { %s932_s22 = smov [#allocation4]  }
   0xe   :  { %s30_s23 = sshll.u32 %s932_s22, 4  ;;  %s31_s23 = int_to_ptr.vmem [resolvable:$true] %s30_s23 }
   0xf   :  { %s913_s24 = scalar_lea.vmem %s31_s23, 32768  ;;  %p918_p6 = scmp.lt.s32.totalorder %s31_s23, %s31_s23 }
  0x10   :  { %p914_p5 = scmp.ne.s32.totalorder %s31_s23, %s913_s24  ;;  %p919_p7 = scmp.lt.s32.totalorder %s913_s24, %s913_s24 }
  0x12   :  { %p920_p8 = por %p919_p7, %p918_p6 }
  0x14   :  { %p921_p9 = pnand %p920_p8, %p914_p5 }
  0x16   :  { %924 = shalt.err (!%p921_p9)
}
  0x17   :  { %36 = dma.hbm_to_vmem [thread:$0]  %s1044_s2, 32768, %s31_s23, [#allocation5], %s930_s18, %s930_s18, %s931_s19  }
  0x18   :  { %925 = dma.done.wait [#allocation3], 2048  }
  0x19   :  { %926 = vsyncadd [#allocation3], 4294965248 }
  0x1a   :  { %927 = dma.done.wait [#allocation5], 32768  }
  0x1b   :  { %928 = vsyncadd [#allocation5], 4294934528  ;;  %v933_v0 = vmov 0.0   ;;  %v57_v1 = vld [vmem:[#allocation2 + $0x38] sm:$0xff]  ;;  %v56_v2 = vld [vmem:[#allocation2 + $0x30] sm:$0xff]  ;;  %vm66_vm0 = vcmask 261120  }
  0x1c   :  { %134 = vmatprep.mubr.f32.mxu0 %v933_v0  ;;  %v55_v3 = vld [vmem:[#allocation2 + $0x28] sm:$0xff]  ;;  %94 = vmatprep.subr.mxu0 %v57_v1  ;;  %v54_v4 = vld [vmem:[#allocation2 + $0x20] sm:$0xff]  ;;  %v53_v5 = vld [vmem:[#allocation2 + $0x18] sm:$0xff] }
  0x1d   :  { %95 = vmatpush1.msra.mxu0 %v56_v2  ;;  %v52_v6 = vld [vmem:[#allocation2 + $0x10] sm:$0xff]  ;;  %v174_v7 = vld [vmem:[#allocation4 + $0xf8] sm:$0xff]  ;;  %v172_v9 = vld [vmem:[#allocation4 + $0xe8] sm:$0xff] }
  0x1e   :  { %96 = vmatprep.subr.mxu0 %v55_v3  ;;  %v173_v8 = vld [vmem:[#allocation4 + $0xf0] sm:$0xff]  ;;  %v51_v10 = vld [vmem:[#allocation2 + $0x8] sm:$0xff]  ;;  %215 = vmatprep.subr.mxu1 %v174_v7  ;;  %v171_v11 = vld [vmem:[#allocation4 + $0xe0] sm:$0xff] }
  0x1f   :  { %97 = vmatpush1.msra.mxu0 %v54_v4  ;;  %v50_v12 = vld [vmem:[#allocation2] sm:$0xff]  ;;  %216 = vmatpush1.msra.mxu1 %v173_v8  ;;  %v170_v13 = vld [vmem:[#allocation4 + $0xd8] sm:$0xff]  ;;  %v169_v15 = vld [vmem:[#allocation4 + $0xd0] sm:$0xff] }
  0x20   :  { %98 = vmatprep.subr.mxu0 %v53_v5  ;;  %v970_v14 = vld [vmem:[%s1042_s0] sm:$0xff]  ;;  %217 = vmatprep.subr.mxu1 %v172_v9  ;;  %v168_v16 = vld [vmem:[#allocation4 + $0xc8] sm:$0xff]  ;;  %v166_v18 = vld [vmem:[#allocation4 + $0xb8] sm:$0xff] }
  0x21   :  { %99 = vmatpush1.msra.mxu0 %v52_v6  ;;  %218 = vmatpush1.msra.mxu1 %v171_v11  ;;  %v167_v17 = vld [vmem:[#allocation4 + $0xc0] sm:$0xff]  ;;  %v165_v19 = vld [vmem:[#allocation4 + $0xb0] sm:$0xff]  ;;  %v164_v20 = vld [vmem:[#allocation4 + $0xa8] sm:$0xff] }
  0x22   :  { %100 = vmatprep.subr.mxu0 %v51_v10  ;;  %219 = vmatprep.subr.mxu1 %v170_v13  ;;  %v163_v21 = vld [vmem:[#allocation4 + $0xa0] sm:$0xff]  ;;  %v162_v22 = vld [vmem:[#allocation4 + $0x98] sm:$0xff]  ;;  %v161_v23 = vld [vmem:[#allocation4 + $0x90] sm:$0xff] }
  0x23   :  { %101 = vmatpush1.msra.mxu0 %v50_v12  ;;  %220 = vmatpush1.msra.mxu1 %v169_v15  ;;  %v160_v24 = vld [vmem:[#allocation4 + $0x88] sm:$0xff]  ;;  %v159_v25 = vld [vmem:[#allocation4 + $0x80] sm:$0xff]  ;;  %v158_v26 = vld [vmem:[#allocation4 + $0x78] sm:$0xff] }
  0x24   :  { %875 = vmatmul.mubr.msk.f32.vlgmr.msra.gmra.mxu0 %vm66_vm0, %v970_v14  ;;  %221 = vmatprep.subr.mxu1 %v168_v16  ;;  %v157_v27 = vld [vmem:[#allocation4 + $0x70] sm:$0xff]  ;;  %v156_v28 = vld [vmem:[#allocation4 + $0x68] sm:$0xff]  ;;  %v155_v29 = vld [vmem:[#allocation4 + $0x60] sm:$0xff] }
  0x25   :  { %222 = vmatpush1.msra.mxu1 %v167_v17  ;;  %v154_v30 = vld [vmem:[#allocation4 + $0x58] sm:$0xff]  ;;  %v153_v31 = vld [vmem:[#allocation4 + $0x50] sm:$0xff]  ;;  %v152_v32 = vld [vmem:[#allocation4 + $0x48] sm:$0xff] }
  0x26   :  { %223 = vmatprep.subr.mxu1 %v166_v18  ;;  %v151_v33 = vld [vmem:[#allocation4 + $0x40] sm:$0xff]  ;;  %v150_v34 = vld [vmem:[#allocation4 + $0x38] sm:$0xff]  ;;  %v149_v35 = vld [vmem:[#allocation4 + $0x30] sm:$0xff] }
  0x27   :  { %224 = vmatpush1.msra.mxu1 %v165_v19  ;;  %v148_v36 = vld [vmem:[#allocation4 + $0x28] sm:$0xff]  ;;  %v147_v37 = vld [vmem:[#allocation4 + $0x20] sm:$0xff]  ;;  %v146_v38 = vld [vmem:[#allocation4 + $0x18] sm:$0xff] }
  0x28   :  { %225 = vmatprep.subr.mxu1 %v164_v20  ;;  %v145_v39 = vld [vmem:[#allocation4 + $0x10] sm:$0xff]  ;;  %v144_v40 = vld [vmem:[#allocation4 + $0x8] sm:$0xff]  ;;  %v143_v41 = vld [vmem:[#allocation4] sm:$0xff] }
  0x29   :  { %226 = vmatpush1.msra.mxu1 %v163_v21  ;;  %v206_v42 = vld [vmem:[#allocation4 + $0x1f8] sm:$0xff]  ;;  %v205_v43 = vld [vmem:[#allocation4 + $0x1f0] sm:$0xff]  ;;  %v204_v44 = vld [vmem:[#allocation4 + $0x1e8] sm:$0xff] }
  0x2a   :  { %227 = vmatprep.subr.mxu1 %v162_v22  ;;  %v203_v45 = vld [vmem:[#allocation4 + $0x1e0] sm:$0xff]  ;;  %v202_v46 = vld [vmem:[#allocation4 + $0x1d8] sm:$0xff]  ;;  %v201_v47 = vld [vmem:[#allocation4 + $0x1d0] sm:$0xff] }
  0x2b   :  { %228 = vmatpush1.msra.mxu1 %v161_v23  ;;  %v200_v48 = vld [vmem:[#allocation4 + $0x1c8] sm:$0xff]  ;;  %v199_v49 = vld [vmem:[#allocation4 + $0x1c0] sm:$0xff]  ;;  %v198_v50 = vld [vmem:[#allocation4 + $0x1b8] sm:$0xff] }
  0x2c   :  { %229 = vmatprep.subr.mxu1 %v160_v24  ;;  %v197_v51 = vld [vmem:[#allocation4 + $0x1b0] sm:$0xff]  ;;  %v196_v52 = vld [vmem:[#allocation4 + $0x1a8] sm:$0xff]  ;;  %v195_v53 = vld [vmem:[#allocation4 + $0x1a0] sm:$0xff] }
  0x2d   :  { %230 = vmatpush1.msra.mxu1 %v159_v25  ;;  %v194_v54 = vld [vmem:[#allocation4 + $0x198] sm:$0xff]  ;;  %v193_v55 = vld [vmem:[#allocation4 + $0x190] sm:$0xff]  ;;  %v192_v56 = vld [vmem:[#allocation4 + $0x188] sm:$0xff] }
  0x2e   :  { %231 = vmatprep.subr.mxu1 %v158_v26  ;;  %v191_v57 = vld [vmem:[#allocation4 + $0x180] sm:$0xff]  ;;  %v190_v58 = vld [vmem:[#allocation4 + $0x178] sm:$0xff]  ;;  %v189_v59 = vld [vmem:[#allocation4 + $0x170] sm:$0xff] }
  0x2f   :  { %232 = vmatpush1.msra.mxu1 %v157_v27  ;;  %v188_v60 = vld [vmem:[#allocation4 + $0x168] sm:$0xff]  ;;  %v187_v61 = vld [vmem:[#allocation4 + $0x160] sm:$0xff]  ;;  %v186_v62 = vld [vmem:[#allocation4 + $0x158] sm:$0xff] }
  0x30   :  { %233 = vmatprep.subr.mxu1 %v156_v28  ;;  %v185_v63 = vld [vmem:[#allocation4 + $0x150] sm:$0xff]  ;;  %v184_v1 = vld [vmem:[#allocation4 + $0x148] sm:$0xff]  ;;  %v183_v2 = vld [vmem:[#allocation4 + $0x140] sm:$0xff] }
  0x31   :  { %234 = vmatpush1.msra.mxu1 %v155_v29  ;;  %v182_v3 = vld [vmem:[#allocation4 + $0x138] sm:$0xff]  ;;  %v181_v4 = vld [vmem:[#allocation4 + $0x130] sm:$0xff]  ;;  %v180_v5 = vld [vmem:[#allocation4 + $0x128] sm:$0xff] }
  0x32   :  { %235 = vmatprep.subr.mxu1 %v154_v30  ;;  %v179_v6 = vld [vmem:[#allocation4 + $0x120] sm:$0xff]  ;;  %v178_v7 = vld [vmem:[#allocation4 + $0x118] sm:$0xff]  ;;  %v177_v8 = vld [vmem:[#allocation4 + $0x110] sm:$0xff] }
  0x33   :  { %236 = vmatpush1.msra.mxu1 %v153_v31  ;;  %v176_v9 = vld [vmem:[#allocation4 + $0x108] sm:$0xff]  ;;  %v175_v10 = vld [vmem:[#allocation4 + $0x100] sm:$0xff]  ;;  %v460_v11 = vld [vmem:[#allocation2 + $0x78] sm:$0xff] }
  0x34   :  { %237 = vmatprep.subr.mxu1 %v152_v32  ;;  %v320_v12 = vld [vmem:[#allocation4 + $0x2f8] sm:$0xff]  ;;  %v319_v13 = vld [vmem:[#allocation4 + $0x2f0] sm:$0xff]  ;;  %v318_v15 = vld [vmem:[#allocation4 + $0x2e8] sm:$0xff] }
  0x35   :  { %238 = vmatpush1.msra.mxu1 %v151_v33  ;;  %361 = vmatprep.subr.mxu0 %v320_v12  ;;  %v317_v16 = vld [vmem:[#allocation4 + $0x2e0] sm:$0xff]  ;;  %v316_v17 = vld [vmem:[#allocation4 + $0x2d8] sm:$0xff]  ;;  %v315_v18 = vld [vmem:[#allocation4 + $0x2d0] sm:$0xff] }
  0x36   :  { %239 = vmatprep.subr.mxu1 %v150_v34  ;;  %362 = vmatpush1.msra.mxu0 %v319_v13  ;;  %v314_v19 = vld [vmem:[#allocation4 + $0x2c8] sm:$0xff]  ;;  %v313_v20 = vld [vmem:[#allocation4 + $0x2c0] sm:$0xff]  ;;  %v312_v21 = vld [vmem:[#allocation4 + $0x2b8] sm:$0xff] }
  0x37   :  { %240 = vmatpush1.msra.mxu1 %v149_v35  ;;  %363 = vmatprep.subr.mxu0 %v318_v15  ;;  %v311_v22 = vld [vmem:[#allocation4 + $0x2b0] sm:$0xff]  ;;  %v310_v23 = vld [vmem:[#allocation4 + $0x2a8] sm:$0xff]  ;;  %v309_v24 = vld [vmem:[#allocation4 + $0x2a0] sm:$0xff] }
  0x38   :  { %241 = vmatprep.subr.mxu1 %v148_v36  ;;  %364 = vmatpush1.msra.mxu0 %v317_v16  ;;  %v308_v25 = vld [vmem:[#allocation4 + $0x298] sm:$0xff]  ;;  %v307_v26 = vld [vmem:[#allocation4 + $0x290] sm:$0xff]  ;;  %v306_v27 = vld [vmem:[#allocation4 + $0x288] sm:$0xff] }
  0x39   :  { %242 = vmatpush1.msra.mxu1 %v147_v37  ;;  %365 = vmatprep.subr.mxu0 %v316_v17  ;;  %v305_v28 = vld [vmem:[#allocation4 + $0x280] sm:$0xff]  ;;  %v304_v29 = vld [vmem:[#allocation4 + $0x278] sm:$0xff]  ;;  %v303_v30 = vld [vmem:[#allocation4 + $0x270] sm:$0xff] }
  0x3a   :  { %243 = vmatprep.subr.mxu1 %v146_v38  ;;  %366 = vmatpush1.msra.mxu0 %v315_v18  ;;  %v302_v31 = vld [vmem:[#allocation4 + $0x268] sm:$0xff]  ;;  %v301_v32 = vld [vmem:[#allocation4 + $0x260] sm:$0xff]  ;;  %v300_v33 = vld [vmem:[#allocation4 + $0x258] sm:$0xff] }
  0x3b   :  { %244 = vmatpush1.msra.mxu1 %v145_v39  ;;  %367 = vmatprep.subr.mxu0 %v314_v19  ;;  %v299_v34 = vld [vmem:[#allocation4 + $0x250] sm:$0xff]  ;;  %v298_v35 = vld [vmem:[#allocation4 + $0x248] sm:$0xff]  ;;  %v297_v36 = vld [vmem:[#allocation4 + $0x240] sm:$0xff] }
  0x3c   :  { %245 = vmatprep.subr.mxu1 %v144_v40  ;;  %368 = vmatpush1.msra.mxu0 %v313_v20  ;;  %v296_v37 = vld [vmem:[#allocation4 + $0x238] sm:$0xff]  ;;  %v295_v38 = vld [vmem:[#allocation4 + $0x230] sm:$0xff]  ;;  %v294_v39 = vld [vmem:[#allocation4 + $0x228] sm:$0xff] }
  0x3d   :  { %246 = vmatpush1.msra.mxu1 %v143_v41  ;;  %369 = vmatprep.subr.mxu0 %v312_v21  ;;  %v293_v40 = vld [vmem:[#allocation4 + $0x220] sm:$0xff]  ;;  %v292_v41 = vld [vmem:[#allocation4 + $0x218] sm:$0xff]  ;;  %v459_v21 = vld [vmem:[#allocation2 + $0x70] sm:$0xff] }
  0x3e   :  { %247 = vmatprep.subr.mxu1 %v206_v42  ;;  %370 = vmatpush1.msra.mxu0 %v311_v22  ;;  %v291_v42 = vld [vmem:[#allocation4 + $0x210] sm:$0xff]  ;;  %v458_v22 = vld [vmem:[#allocation2 + $0x68] sm:$0xff] }
  0x3f   :  { %248 = vmatpush2.msra.mxu1 %v205_v43  ;;  %371 = vmatprep.subr.mxu0 %v310_v23  ;;  %v290_v43 = vld [vmem:[#allocation4 + $0x208] sm:$0xff]  ;;  %v457_v23 = vld [vmem:[#allocation2 + $0x60] sm:$0xff] }
  0x40   :  { %249 = vmatprep.subr.mxu1 %v204_v44  ;;  %372 = vmatpush1.msra.mxu0 %v309_v24  ;;  %v289_v44 = vld [vmem:[#allocation4 + $0x200] sm:$0xff]  ;;  %v456_v24 = vld [vmem:[#allocation2 + $0x58] sm:$0xff] }
  0x41   :  { %250 = vmatpush2.msra.mxu1 %v203_v45  ;;  %373 = vmatprep.subr.mxu0 %v308_v25  ;;  %v352_v45 = vld [vmem:[#allocation4 + $0x3f8] sm:$0xff]  ;;  %v455_v25 = vld [vmem:[#allocation2 + $0x50] sm:$0xff] }
  0x42   :  { %251 = vmatprep.subr.mxu1 %v202_v46  ;;  %374 = vmatpush1.msra.mxu0 %v307_v26  ;;  %v351_v46 = vld [vmem:[#allocation4 + $0x3f0] sm:$0xff]  ;;  %v454_v26 = vld [vmem:[#allocation2 + $0x48] sm:$0xff] }
  0x43   :  { %252 = vmatpush2.msra.mxu1 %v201_v47  ;;  %375 = vmatprep.subr.mxu0 %v306_v27  ;;  %v350_v47 = vld [vmem:[#allocation4 + $0x3e8] sm:$0xff]  ;;  %v453_v27 = vld [vmem:[#allocation2 + $0x40] sm:$0xff] }
  0x44   :  { %253 = vmatprep.subr.mxu1 %v200_v48  ;;  %376 = vmatpush1.msra.mxu0 %v305_v28  ;;  %v349_v48 = vld [vmem:[#allocation4 + $0x3e0] sm:$0xff]  ;;  %v327_v28 = vld [vmem:[#allocation4 + $0x330] sm:$0xff] }
  0x45   :  { %254 = vmatpush2.msra.mxu1 %v199_v49  ;;  %377 = vmatprep.subr.mxu0 %v304_v29  ;;  %v348_v49 = vld [vmem:[#allocation4 + $0x3d8] sm:$0xff]  ;;  %v326_v29 = vld [vmem:[#allocation4 + $0x328] sm:$0xff] }
  0x46   :  { %255 = vmatprep.subr.mxu1 %v198_v50  ;;  %378 = vmatpush1.msra.mxu0 %v303_v30  ;;  %v347_v50 = vld [vmem:[#allocation4 + $0x3d0] sm:$0xff]  ;;  %v325_v30 = vld [vmem:[#allocation4 + $0x320] sm:$0xff] }
  0x47   :  { %256 = vmatpush2.msra.mxu1 %v197_v51  ;;  %379 = vmatprep.subr.mxu0 %v302_v31  ;;  %v346_v51 = vld [vmem:[#allocation4 + $0x3c8] sm:$0xff]  ;;  %v324_v31 = vld [vmem:[#allocation4 + $0x318] sm:$0xff] }
  0x48   :  { %257 = vmatprep.subr.mxu1 %v196_v52  ;;  %380 = vmatpush1.msra.mxu0 %v301_v32  ;;  %v345_v52 = vld [vmem:[#allocation4 + $0x3c0] sm:$0xff]  ;;  %v322_v32 = vld [vmem:[#allocation4 + $0x308] sm:$0xff] }
  0x49   :  { %258 = vmatpush2.msra.mxu1 %v195_v53  ;;  %381 = vmatprep.subr.mxu0 %v300_v33  ;;  %v344_v53 = vld [vmem:[#allocation4 + $0x3b8] sm:$0xff]  ;;  %v321_v33 = vld [vmem:[#allocation4 + $0x300] sm:$0xff] }
  0x4a   :  { %259 = vmatprep.subr.mxu1 %v194_v54  ;;  %382 = vmatpush1.msra.mxu0 %v299_v34  ;;  %v343_v54 = vld [vmem:[#allocation4 + $0x3b0] sm:$0xff]  ;;  %v574_v34 = vld [vmem:[#allocation4 + $0x4f8] sm:$0xff] }
  0x4b   :  { %260 = vmatpush2.msra.mxu1 %v193_v55  ;;  %383 = vmatprep.subr.mxu0 %v298_v35  ;;  %v342_v55 = vld [vmem:[#allocation4 + $0x3a8] sm:$0xff] }
  0x4c   :  { %261 = vmatprep.subr.mxu1 %v192_v56  ;;  %384 = vmatpush1.msra.mxu0 %v297_v36  ;;  %v341_v56 = vld [vmem:[#allocation4 + $0x3a0] sm:$0xff] }
  0x4d   :  { %262 = vmatpush2.msra.mxu1 %v191_v57  ;;  %385 = vmatprep.subr.mxu0 %v296_v37  ;;  %v340_v57 = vld [vmem:[#allocation4 + $0x398] sm:$0xff] }
  0x4e   :  { %263 = vmatprep.subr.mxu1 %v190_v58  ;;  %386 = vmatpush1.msra.mxu0 %v295_v38  ;;  %v339_v58 = vld [vmem:[#allocation4 + $0x390] sm:$0xff] }
  0x4f   :  { %264 = vmatpush2.msra.mxu1 %v189_v59  ;;  %387 = vmatprep.subr.mxu0 %v294_v39  ;;  %v338_v59 = vld [vmem:[#allocation4 + $0x388] sm:$0xff] }
  0x50   :  { %265 = vmatprep.subr.mxu1 %v188_v60  ;;  %388 = vmatpush1.msra.mxu0 %v293_v40  ;;  %v337_v60 = vld [vmem:[#allocation4 + $0x380] sm:$0xff] }
  0x51   :  { %266 = vmatpush2.msra.mxu1 %v187_v61  ;;  %389 = vmatprep.subr.mxu0 %v292_v41  ;;  %v336_v61 = vld [vmem:[#allocation4 + $0x378] sm:$0xff] }
  0x52   :  { %267 = vmatprep.subr.mxu1 %v186_v62  ;;  %390 = vmatpush1.msra.mxu0 %v291_v42  ;;  %v335_v62 = vld [vmem:[#allocation4 + $0x370] sm:$0xff]  ;;  %v1007_v41 = vld [vmem:[%s1045_s3 + $0x18] sm:$0xff] }
  0x53   :  { %268 = vmatpush2.msra.mxu1 %v185_v63  ;;  %391 = vmatprep.subr.mxu0 %v290_v43  ;;  %v334_v63 = vld [vmem:[#allocation4 + $0x368] sm:$0xff] }
  0x54   :  { %269 = vmatprep.subr.mxu1 %v184_v1  ;;  %392 = vmatpush1.msra.mxu0 %v289_v44  ;;  %v333_v1 = vld [vmem:[#allocation4 + $0x360] sm:$0xff]  ;;  %v573_v44 = vld [vmem:[#allocation4 + $0x4f0] sm:$0xff] }
  0x55   :  { %270 = vmatpush2.msra.mxu1 %v183_v2  ;;  %393 = vmatprep.subr.mxu0 %v352_v45  ;;  %v332_v2 = vld [vmem:[#allocation4 + $0x358] sm:$0xff]  ;;  %v572_v45 = vld [vmem:[#allocation4 + $0x4e8] sm:$0xff] }
  0x56   :  { %271 = vmatprep.subr.mxu1 %v182_v3  ;;  %394 = vmatpush2.msra.mxu0 %v351_v46  ;;  %v331_v3 = vld [vmem:[#allocation4 + $0x350] sm:$0xff] }
  0x57   :  { %272 = vmatpush2.msra.mxu1 %v181_v4  ;;  %395 = vmatprep.subr.mxu0 %v350_v47  ;;  %v330_v4 = vld [vmem:[#allocation4 + $0x348] sm:$0xff]  ;;  %v571_v47 = vld [vmem:[#allocation4 + $0x4e0] sm:$0xff] }
  0x58   :  { %273 = vmatprep.subr.mxu1 %v180_v5  ;;  %396 = vmatpush2.msra.mxu0 %v349_v48  ;;  %v329_v5 = vld [vmem:[#allocation4 + $0x340] sm:$0xff] }
  0x59   :  { %274 = vmatpush2.msra.mxu1 %v179_v6  ;;  %397 = vmatprep.subr.mxu0 %v348_v49  ;;  %v328_v6 = vld [vmem:[#allocation4 + $0x338] sm:$0xff] }
  0x5a   :  { %275 = vmatprep.subr.mxu1 %v178_v7  ;;  %398 = vmatpush2.msra.mxu0 %v347_v50  ;;  %v58_v7 = vlaneseq  ;;  %v570_v49 = vld [vmem:[#allocation4 + $0x4d8] sm:$0xff]  ;;  %v569_v50 = vld [vmem:[#allocation4 + $0x4d0] sm:$0xff] }
  0x5b   :  { %276 = vmatpush2.msra.mxu1 %v177_v8  ;;  %399 = vmatprep.subr.mxu0 %v346_v51 }
  0x5c   :  { %277 = vmatprep.subr.mxu1 %v176_v9  ;;  %400 = vmatpush2.msra.mxu0 %v345_v52  ;;  %v975_v8 = vshrl.u32 %v58_v7, 7  ;;  %v568_v52 = vld [vmem:[#allocation4 + $0x4c8] sm:$0xff] }
  0x5d   :  { %278 = vmatpush2.msra.mxu1 %v175_v10  ;;  %401 = vmatprep.subr.mxu0 %v344_v53  ;;  %v983_v10 = vld [vmem:[%s1045_s3] sm:$0xff] }
  0x5e   :  { %493 = vmatprep.subr.mxu1 %v460_v11  ;;  %402 = vmatpush2.msra.mxu0 %v343_v54  ;;  %v978_v9 = vsub.s32 0, %v975_v8  ;;  %v988_v11 = vld [vmem:[%s1045_s3 + $0x8] sm:$0xff]  ;;  %v998_v35 = vsub.s32 1, %v975_v8  ;;  %v567_v54 = vld [vmem:[#allocation4 + $0x4c0] sm:$0xff] }
  0x5f   :  { %403 = vmatprep.subr.mxu0 %v342_v55  ;;  %v566_v55 = vld [vmem:[#allocation4 + $0x4b8] sm:$0xff] }
  0x60   :  { %404 = vmatpush2.msra.mxu0 %v341_v56  ;;  %v61_v12 = vrot.slane %v983_v10, %v978_v9  ;;  %v65_v13 = vrot.slane %v988_v11, %v978_v9  ;;  %v214_v36 = vrot.slane %v988_v11, %v998_v35  ;;  %v468_v46 = vrot.slane %v1007_v41, %v978_v9 }
  0x61   :  { %405 = vmatprep.subr.mxu0 %v340_v57  ;;  %v565_v57 = vld [vmem:[#allocation4 + $0x4b0] sm:$0xff] }
  0x62   :  { %406 = vmatpush2.msra.mxu0 %v339_v58  ;;  %v564_v58 = vld [vmem:[#allocation4 + $0x4a8] sm:$0xff] }
  0x63   :  { %407 = vmatprep.subr.mxu0 %v338_v59  ;;  %v563_v59 = vld [vmem:[#allocation4 + $0x4a0] sm:$0xff] }
  0x64   :  { %408 = vmatpush2.msra.mxu0 %v337_v60  ;;  %v562_v60 = vld [vmem:[#allocation4 + $0x498] sm:$0xff] }
  0x65   :  { %409 = vmatprep.subr.mxu0 %v336_v61  ;;  %v561_v61 = vld [vmem:[#allocation4 + $0x490] sm:$0xff] }
  0x66   :  { %410 = vmatpush2.msra.mxu0 %v335_v62  ;;  %v560_v62 = vld [vmem:[#allocation4 + $0x488] sm:$0xff] }
  0x67   :  { %411 = vmatprep.subr.mxu0 %v334_v63  ;;  %v559_v63 = vld [vmem:[#allocation4 + $0x480] sm:$0xff] }
  0x68   :  { %412 = vmatpush2.msra.mxu0 %v333_v1  ;;  %v558_v1 = vld [vmem:[#allocation4 + $0x478] sm:$0xff] }
  0x69   :  { %413 = vmatprep.subr.mxu0 %v332_v2  ;;  %v557_v2 = vld [vmem:[#allocation4 + $0x470] sm:$0xff] }
  0x6a   :  { %414 = vmatpush2.msra.mxu0 %v331_v3  ;;  %v556_v3 = vld [vmem:[#allocation4 + $0x468] sm:$0xff] }
  0x6b   :  { %415 = vmatprep.subr.mxu0 %v330_v4  ;;  %v555_v4 = vld [vmem:[#allocation4 + $0x460] sm:$0xff] }
  0x6c   :  { %416 = vmatpush2.msra.mxu0 %v329_v5  ;;  %v554_v5 = vld [vmem:[#allocation4 + $0x458] sm:$0xff] }
  0x6d   :  { %417 = vmatprep.subr.mxu0 %v328_v6  ;;  %v553_v6 = vld [vmem:[#allocation4 + $0x450] sm:$0xff] }
  0x6e   :  { %418 = vmatpush2.msra.mxu0 %v327_v28  ;;  %v601_v28 = vld [vmem:[#allocation4 + $0x5d0] sm:$0xff] }
  0x6f   :  { %419 = vmatprep.subr.mxu0 %v326_v29  ;;  %v600_v29 = vld [vmem:[#allocation4 + $0x5c8] sm:$0xff] }
  0x70   :  { %420 = vmatpush2.msra.mxu0 %v325_v30  ;;  %v599_v30 = vld [vmem:[#allocation4 + $0x5c0] sm:$0xff] }
  0x71   :  { %421 = vmatprep.subr.mxu0 %v324_v31  ;;  %v598_v31 = vld [vmem:[#allocation4 + $0x5b8] sm:$0xff] }
  0xe4   :  { %v136_v15 = vpop.f32.mrf.mxu0 }
  0xe5   :  { %v137_v16 = vadd.f32 %v136_v15, %v61_v12  ;;  %v552_v12 = vld [vmem:[#allocation4 + $0x448] sm:$0xff]  ;;  %v550_v15 = vld [vmem:[#allocation4 + $0x438] sm:$0xff] }
  0xe6   :  { %v138_v17 = vpop.f32.mrf.mxu0 }
  0xe7   :  { %v139_v18 = vadd.f32 %v138_v17, %v65_v13  ;;  %v141_v20 = vmax.f32 %v137_v16, 0.0  ;;  %v551_v13 = vld [vmem:[#allocation4 + $0x440] sm:$0xff]  ;;  %v549_v16 = vld [vmem:[#allocation4 + $0x430] sm:$0xff]  ;;  %v548_v17 = vld [vmem:[#allocation4 + $0x428] sm:$0xff] }
  0xe9   :  { %v142_v19 = vmax.f32 %v139_v18, 0.0  ;;  %v547_v18 = vld [vmem:[#allocation4 + $0x420] sm:$0xff] }
  0xeb   :  { %279 = vmatprep.mubr.f32.mxu1 %v142_v19  ;;  %v546_v19 = vld [vmem:[#allocation4 + $0x418] sm:$0xff] }
  0xec   :  { %280 = vmatmul.mubr.f32.vlgmr.msra.gmra.mxu1 %v141_v20  ;;  %v545_v20 = vld [vmem:[#allocation4 + $0x410] sm:$0xff] }
  0xed   :  { %494 = vmatpush1.msra.mxu1 %v459_v21  ;;  %533 = vmatprep.mubr.f32.mxu1 %v933_v0  ;;  %v323_v0 = vld [vmem:[#allocation4 + $0x310] sm:$0xff]  ;;  %v544_v21 = vld [vmem:[#allocation4 + $0x408] sm:$0xff] }
  0xee   :  { %495 = vmatprep.subr.mxu1 %v458_v22  ;;  %422 = vmatpush2.msra.mxu0 %v323_v0  ;;  %v543_v22 = vld [vmem:[#allocation4 + $0x400] sm:$0xff]  ;;  %v597_v0 = vld [vmem:[#allocation4 + $0x5b0] sm:$0xff] }
  0xef   :  { %496 = vmatpush1.msra.mxu1 %v457_v23  ;;  %423 = vmatprep.subr.mxu0 %v322_v32  ;;  %v606_v23 = vld [vmem:[#allocation4 + $0x5f8] sm:$0xff]  ;;  %v596_v32 = vld [vmem:[#allocation4 + $0x5a8] sm:$0xff] }
  0xf0   :  { %497 = vmatprep.subr.mxu1 %v456_v24  ;;  %424 = vmatpush2.msra.mxu0 %v321_v33  ;;  %v605_v24 = vld [vmem:[#allocation4 + $0x5f0] sm:$0xff]  ;;  %v595_v33 = vld [vmem:[#allocation4 + $0x5a0] sm:$0xff] }
  0xf1   :  { %498 = vmatpush1.msra.mxu1 %v455_v25  ;;  %615 = vmatprep.subr.mxu0 %v574_v34  ;;  %v604_v25 = vld [vmem:[#allocation4 + $0x5e8] sm:$0xff]  ;;  %v594_v34 = vld [vmem:[#allocation4 + $0x598] sm:$0xff] }
  0xf2   :  { %499 = vmatprep.subr.mxu1 %v454_v26  ;;  %v603_v26 = vld [vmem:[#allocation4 + $0x5e0] sm:$0xff] }
  0xf3   :  { %500 = vmatpush1.msra.mxu1 %v453_v27  ;;  %v602_v27 = vld [vmem:[#allocation4 + $0x5d8] sm:$0xff] }
  0xf4   :  { %876 = vmatmul.mubr.msk.f32.vlgmr.msra.gmra.mxu1 %vm66_vm0, %v970_v14  ;;  %v210_v14 = vrot.slane %v983_v10, %v998_v35 }
 0x1ac   :  { %v281_v37 = vpop.f32.mrf.mxu1 }
 0x1ad   :  { %v282_v38 = vadd.f32 %v281_v37, %v210_v14  ;;  %v593_v14 = vld [vmem:[#allocation4 + $0x590] sm:$0xff]  ;;  %v591_v37 = vld [vmem:[#allocation4 + $0x580] sm:$0xff] }
 0x1ae   :  { %v283_v39 = vpop.f32.mrf.mxu1 }
 0x1af   :  { %v284_v40 = vadd.f32 %v283_v39, %v214_v36  ;;  %v286_v43 = vmax.f32 %v282_v38, 0.0  ;;  %v592_v36 = vld [vmem:[#allocation4 + $0x588] sm:$0xff]  ;;  %v590_v38 = vld [vmem:[#allocation4 + $0x578] sm:$0xff]  ;;  %v589_v39 = vld [vmem:[#allocation4 + $0x570] sm:$0xff] }
 0x1b1   :  { %v287_v42 = vmax.f32 %v284_v40, 0.0  ;;  %v588_v40 = vld [vmem:[#allocation4 + $0x568] sm:$0xff] }
 0x1b3   :  { %425 = vmatprep.mubr.f32.mxu0 %v287_v42  ;;  %v587_v42 = vld [vmem:[#allocation4 + $0x560] sm:$0xff] }
 0x1b4   :  { %426 = vmatmul.mubr.f32.vlgmr.msra.gmra.mxu0 %v286_v43  ;;  %v1011_v48 = vpop.f32.mrf.mxu1  ;;  %v586_v43 = vld [vmem:[#allocation4 + $0x558] sm:$0xff] }
 0x1b5   :  { %616 = vmatpush1.msra.mxu0 %v573_v44  ;;  %v585_v44 = vld [vmem:[#allocation4 + $0x550] sm:$0xff] }
 0x1b6   :  { %617 = vmatprep.subr.mxu0 %v572_v45  ;;  %v537_v51 = vpop.f32.mrf.mxu1  ;;  %v1016_v45 = vld [vmem:[%s1045_s3 + $0x10] sm:$0xff] }
 0x1b7   :  { %618 = vmatpush1.msra.mxu0 %v571_v47  ;;  %v538_v53 = vadd.f32 %v537_v51, %v468_v46  ;;  %v584_v46 = vld [vmem:[#allocation4 + $0x548] sm:$0xff]  ;;  %v583_v47 = vld [vmem:[#allocation4 + $0x540] sm:$0xff]  ;;  %v581_v51 = vld [vmem:[#allocation4 + $0x530] sm:$0xff] }
 0x1b8   :  { %619 = vmatprep.subr.mxu0 %v570_v49  ;;  %v582_v49 = vld [vmem:[#allocation4 + $0x538] sm:$0xff] }
 0x1b9   :  { %620 = vmatpush1.msra.mxu0 %v569_v50  ;;  %v541_v56 = vmax.f32 %v538_v53, 0.0  ;;  %v464_v50 = vrot.slane %v1016_v45, %v978_v9  ;;  %v579_v53 = vld [vmem:[#allocation4 + $0x520] sm:$0xff]  ;;  %v720_v9 = vld [vmem:[#allocation4 + $0x6f8] sm:$0xff] }
 0x1ba   :  { %621 = vmatprep.subr.mxu0 %v568_v52  ;;  %v580_v52 = vld [vmem:[#allocation4 + $0x528] sm:$0xff]  ;;  %761 = vmatprep.subr.mxu1 %v720_v9  ;;  %v727_v9 = vld [vmem:[#allocation4 + $0x730] sm:$0xff] }
 0x1bb   :  { %622 = vmatpush1.msra.mxu0 %v567_v54  ;;  %679 = vmatprep.mubr.f32.mxu0 %v541_v56  ;;  %v578_v54 = vld [vmem:[#allocation4 + $0x518] sm:$0xff]  ;;  %v577_v56 = vld [vmem:[#allocation4 + $0x510] sm:$0xff] }
 0x1bc   :  { %623 = vmatprep.subr.mxu0 %v566_v55  ;;  %v536_v55 = vadd.f32 %v1011_v48, %v464_v50  ;;  %v715_v48 = vld [vmem:[#allocation4 + $0x6d0] sm:$0xff]  ;;  %v737_v50 = vld [vmem:[#allocation4 + $0x780] sm:$0xff] }
 0x1bd   :  { %624 = vmatpush1.msra.mxu0 %v565_v57  ;;  %v576_v57 = vld [vmem:[#allocation4 + $0x508] sm:$0xff] }
 0x1be   :  { %625 = vmatprep.subr.mxu0 %v564_v58  ;;  %v575_v58 = vld [vmem:[#allocation4 + $0x500] sm:$0xff] }
 0x1bf   :  { %626 = vmatpush1.msra.mxu0 %v563_v59  ;;  %v540_v59 = vmax.f32 %v536_v55, 0.0  ;;  %v732_v55 = vld [vmem:[#allocation4 + $0x758] sm:$0xff] }
 0x1c0   :  { %627 = vmatprep.subr.mxu0 %v562_v60  ;;  %v719_v60 = vld [vmem:[#allocation4 + $0x6f0] sm:$0xff] }
 0x1c1   :  { %628 = vmatpush1.msra.mxu0 %v561_v61  ;;  %v718_v61 = vld [vmem:[#allocation4 + $0x6e8] sm:$0xff]  ;;  %762 = vmatpush1.msra.mxu1 %v719_v60 }
 0x1c2   :  { %629 = vmatprep.subr.mxu0 %v560_v62  ;;  %v717_v62 = vld [vmem:[#allocation4 + $0x6e0] sm:$0xff]  ;;  %763 = vmatprep.subr.mxu1 %v718_v61  ;;  %v726_v60 = vld [vmem:[#allocation4 + $0x728] sm:$0xff] }
 0x1c3   :  { %630 = vmatpush1.msra.mxu0 %v559_v63  ;;  %v716_v63 = vld [vmem:[#allocation4 + $0x6d8] sm:$0xff]  ;;  %764 = vmatpush1.msra.mxu1 %v717_v62  ;;  %v725_v61 = vld [vmem:[#allocation4 + $0x720] sm:$0xff] }
 0x1c4   :  { %631 = vmatprep.subr.mxu0 %v558_v1  ;;  %v714_v1 = vld [vmem:[#allocation4 + $0x6c8] sm:$0xff]  ;;  %765 = vmatprep.subr.mxu1 %v716_v63  ;;  %v724_v62 = vld [vmem:[#allocation4 + $0x718] sm:$0xff]  ;;  %v723_v63 = vld [vmem:[#allocation4 + $0x710] sm:$0xff] }
 0x1c5   :  { %632 = vmatpush1.msra.mxu0 %v557_v2  ;;  %v713_v2 = vld [vmem:[#allocation4 + $0x6c0] sm:$0xff]  ;;  %766 = vmatpush1.msra.mxu1 %v715_v48  ;;  %v722_v48 = vld [vmem:[#allocation4 + $0x708] sm:$0xff] }
 0x1c6   :  { %633 = vmatprep.subr.mxu0 %v556_v3  ;;  %v712_v3 = vld [vmem:[#allocation4 + $0x6b8] sm:$0xff]  ;;  %767 = vmatprep.subr.mxu1 %v714_v1  ;;  %v721_v1 = vld [vmem:[#allocation4 + $0x700] sm:$0xff] }
 0x1c7   :  { %634 = vmatpush1.msra.mxu0 %v555_v4  ;;  %v711_v4 = vld [vmem:[#allocation4 + $0x6b0] sm:$0xff]  ;;  %768 = vmatpush1.msra.mxu1 %v713_v2  ;;  %v355_v2 = vsub.s32 2, %v975_v8 }
 0x1c8   :  { %635 = vmatprep.subr.mxu0 %v554_v5  ;;  %v710_v5 = vld [vmem:[#allocation4 + $0x6a8] sm:$0xff]  ;;  %769 = vmatprep.subr.mxu1 %v712_v3 }
 0x1c9   :  { %636 = vmatpush1.msra.mxu0 %v553_v6  ;;  %v709_v6 = vld [vmem:[#allocation4 + $0x6a0] sm:$0xff]  ;;  %770 = vmatpush1.msra.mxu1 %v711_v4  ;;  %v356_v3 = vrot.slane %v983_v10, %v355_v2  ;;  %v436_v4 = vsub.s32 3, %v975_v8 }
 0x1ca   :  { %637 = vmatprep.subr.mxu0 %v552_v12  ;;  %v708_v12 = vld [vmem:[#allocation4 + $0x698] sm:$0xff]  ;;  %771 = vmatprep.subr.mxu1 %v710_v5  ;;  %v360_v5 = vrot.slane %v988_v11, %v355_v2 }
 0x1cb   :  { %638 = vmatpush1.msra.mxu0 %v551_v13  ;;  %v707_v13 = vld [vmem:[#allocation4 + $0x690] sm:$0xff]  ;;  %772 = vmatpush1.msra.mxu1 %v709_v6 }
 0x1cc   :  { %639 = vmatprep.subr.mxu0 %v550_v15  ;;  %v706_v15 = vld [vmem:[#allocation4 + $0x688] sm:$0xff]  ;;  %773 = vmatprep.subr.mxu1 %v708_v12 }
 0x1cd   :  { %640 = vmatpush1.msra.mxu0 %v549_v16  ;;  %v705_v16 = vld [vmem:[#allocation4 + $0x680] sm:$0xff]  ;;  %774 = vmatpush1.msra.mxu1 %v707_v13 }
 0x1ce   :  { %641 = vmatprep.subr.mxu0 %v548_v17  ;;  %v704_v17 = vld [vmem:[#allocation4 + $0x678] sm:$0xff]  ;;  %775 = vmatprep.subr.mxu1 %v706_v15 }
 0x1cf   :  { %642 = vmatpush1.msra.mxu0 %v547_v18  ;;  %v703_v18 = vld [vmem:[#allocation4 + $0x670] sm:$0xff]  ;;  %776 = vmatpush1.msra.mxu1 %v705_v16  ;;  %v437_v16 = vrot.slane %v983_v10, %v436_v4 }
 0x1d0   :  { %643 = vmatprep.subr.mxu0 %v546_v19  ;;  %v702_v19 = vld [vmem:[#allocation4 + $0x668] sm:$0xff]  ;;  %777 = vmatprep.subr.mxu1 %v704_v17 }
 0x1d1   :  { %644 = vmatpush1.msra.mxu0 %v545_v20  ;;  %v701_v20 = vld [vmem:[#allocation4 + $0x660] sm:$0xff]  ;;  %778 = vmatpush1.msra.mxu1 %v703_v18  ;;  %v441_v18 = vrot.slane %v988_v11, %v436_v4  ;;  %v756_v11 = vrot.slane %v1016_v45, %v355_v2 }
 0x1d2   :  { %645 = vmatprep.subr.mxu0 %v544_v21  ;;  %v700_v21 = vld [vmem:[#allocation4 + $0x658] sm:$0xff]  ;;  %779 = vmatprep.subr.mxu1 %v702_v19 }
 0x1d3   :  { %646 = vmatpush1.msra.mxu0 %v543_v22  ;;  %v699_v22 = vld [vmem:[#allocation4 + $0x650] sm:$0xff]  ;;  %780 = vmatpush1.msra.mxu1 %v701_v20 }
 0x1d4   :  { %647 = vmatprep.subr.mxu0 %v606_v23  ;;  %v698_v23 = vld [vmem:[#allocation4 + $0x648] sm:$0xff]  ;;  %781 = vmatprep.subr.mxu1 %v700_v21 }
 0x1d5   :  { %648 = vmatpush2.msra.mxu0 %v605_v24  ;;  %v697_v24 = vld [vmem:[#allocation4 + $0x640] sm:$0xff]  ;;  %782 = vmatpush1.msra.mxu1 %v699_v22 }
 0x1d6   :  { %649 = vmatprep.subr.mxu0 %v604_v25  ;;  %v696_v25 = vld [vmem:[#allocation4 + $0x638] sm:$0xff]  ;;  %783 = vmatprep.subr.mxu1 %v698_v23  ;;  %v610_v23 = vrot.slane %v1016_v45, %v998_v35 }
 0x1d7   :  { %650 = vmatpush2.msra.mxu0 %v603_v26  ;;  %v695_v26 = vld [vmem:[#allocation4 + $0x630] sm:$0xff]  ;;  %784 = vmatpush1.msra.mxu1 %v697_v24  ;;  %v614_v24 = vrot.slane %v1007_v41, %v998_v35  ;;  %v841_v35 = vrot.slane %v1007_v41, %v436_v4 }
 0x1d8   :  { %651 = vmatprep.subr.mxu0 %v602_v27  ;;  %v694_v27 = vld [vmem:[#allocation4 + $0x628] sm:$0xff]  ;;  %785 = vmatprep.subr.mxu1 %v696_v25 }
 0x1d9   :  { %652 = vmatpush2.msra.mxu0 %v601_v28  ;;  %v693_v28 = vld [vmem:[#allocation4 + $0x620] sm:$0xff]  ;;  %786 = vmatpush1.msra.mxu1 %v695_v26 }
 0x1da   :  { %653 = vmatprep.subr.mxu0 %v600_v29  ;;  %v692_v29 = vld [vmem:[#allocation4 + $0x618] sm:$0xff]  ;;  %787 = vmatprep.subr.mxu1 %v694_v27 }
 0x1db   :  { %654 = vmatpush2.msra.mxu0 %v599_v30  ;;  %v691_v30 = vld [vmem:[#allocation4 + $0x610] sm:$0xff]  ;;  %788 = vmatpush1.msra.mxu1 %v693_v28 }
 0x1dc   :  { %655 = vmatprep.subr.mxu0 %v598_v31  ;;  %v690_v31 = vld [vmem:[#allocation4 + $0x608] sm:$0xff]  ;;  %789 = vmatprep.subr.mxu1 %v692_v29 }
 0x1dd   :  { %656 = vmatpush2.msra.mxu0 %v597_v0  ;;  %v689_v0 = vld [vmem:[#allocation4 + $0x600] sm:$0xff]  ;;  %790 = vmatpush1.msra.mxu1 %v691_v30 }
 0x1de   :  { %657 = vmatprep.subr.mxu0 %v596_v32  ;;  %v752_v32 = vld [vmem:[#allocation4 + $0x7f8] sm:$0xff]  ;;  %791 = vmatprep.subr.mxu1 %v690_v31  ;;  %v760_v31 = vrot.slane %v1007_v41, %v355_v2 }
 0x1df   :  { %658 = vmatpush2.msra.mxu0 %v595_v33  ;;  %v751_v33 = vld [vmem:[#allocation4 + $0x7f0] sm:$0xff]  ;;  %792 = vmatpush1.msra.mxu1 %v689_v0 }
 0x1e0   :  { %659 = vmatprep.subr.mxu0 %v594_v34  ;;  %v750_v34 = vld [vmem:[#allocation4 + $0x7e8] sm:$0xff]  ;;  %793 = vmatprep.subr.mxu1 %v752_v32 }
 0x1e1   :  { %660 = vmatpush2.msra.mxu0 %v593_v14  ;;  %v749_v14 = vld [vmem:[#allocation4 + $0x7e0] sm:$0xff]  ;;  %794 = vmatpush2.msra.mxu1 %v751_v33 }
 0x1e2   :  { %661 = vmatprep.subr.mxu0 %v592_v36  ;;  %v748_v36 = vld [vmem:[#allocation4 + $0x7d8] sm:$0xff]  ;;  %795 = vmatprep.subr.mxu1 %v750_v34 }
 0x1e3   :  { %662 = vmatpush2.msra.mxu0 %v591_v37  ;;  %v747_v37 = vld [vmem:[#allocation4 + $0x7d0] sm:$0xff]  ;;  %796 = vmatpush2.msra.mxu1 %v749_v14 }
 0x1e4   :  { %663 = vmatprep.subr.mxu0 %v590_v38  ;;  %v746_v38 = vld [vmem:[#allocation4 + $0x7c8] sm:$0xff]  ;;  %797 = vmatprep.subr.mxu1 %v748_v36  ;;  %v837_v36 = vrot.slane %v1016_v45, %v436_v4 }
 0x1e5   :  { %664 = vmatpush2.msra.mxu0 %v589_v39  ;;  %v745_v39 = vld [vmem:[#allocation4 + $0x7c0] sm:$0xff]  ;;  %798 = vmatpush2.msra.mxu1 %v747_v37 }
 0x1e6   :  { %665 = vmatprep.subr.mxu0 %v588_v40  ;;  %v744_v40 = vld [vmem:[#allocation4 + $0x7b8] sm:$0xff]  ;;  %799 = vmatprep.subr.mxu1 %v746_v38 }
 0x1e7   :  { %666 = vmatpush2.msra.mxu0 %v587_v42  ;;  %v743_v42 = vld [vmem:[#allocation4 + $0x7b0] sm:$0xff]  ;;  %800 = vmatpush2.msra.mxu1 %v745_v39 }
 0x1e8   :  { %667 = vmatprep.subr.mxu0 %v586_v43  ;;  %v742_v43 = vld [vmem:[#allocation4 + $0x7a8] sm:$0xff]  ;;  %801 = vmatprep.subr.mxu1 %v744_v40 }
 0x1e9   :  { %668 = vmatpush2.msra.mxu0 %v585_v44  ;;  %v741_v44 = vld [vmem:[#allocation4 + $0x7a0] sm:$0xff]  ;;  %802 = vmatpush2.msra.mxu1 %v743_v42  ;;  %v934_v42 = vmov 0  }
 0x1ea   :  { %669 = vmatprep.subr.mxu0 %v584_v46  ;;  %v740_v46 = vld [vmem:[#allocation4 + $0x798] sm:$0xff]  ;;  %803 = vmatprep.subr.mxu1 %v742_v43  ;;  %v449_v43 = vsub.s32 4, %v975_v8 }
 0x1eb   :  { %670 = vmatpush2.msra.mxu0 %v583_v47  ;;  %v739_v47 = vld [vmem:[#allocation4 + $0x790] sm:$0xff]  ;;  %804 = vmatpush2.msra.mxu1 %v741_v44 }
 0x1ec   :  { %671 = vmatprep.subr.mxu0 %v582_v49  ;;  %v738_v49 = vld [vmem:[#allocation4 + $0x788] sm:$0xff]  ;;  %805 = vmatprep.subr.mxu1 %v740_v46  ;;  %v850_v44 = vrot.slane %v1016_v45, %v449_v43 }
 0x1ed   :  { %672 = vmatpush2.msra.mxu0 %v581_v51  ;;  %806 = vmatpush2.msra.mxu1 %v739_v47  ;;  %v736_v51 = vld [vmem:[#allocation4 + $0x778] sm:$0xff] }
 0x1ee   :  { %673 = vmatprep.subr.mxu0 %v580_v52  ;;  %807 = vmatprep.subr.mxu1 %v738_v49  ;;  %v735_v52 = vld [vmem:[#allocation4 + $0x770] sm:$0xff]  ;;  %v450_v49 = vrot.slane %v983_v10, %v449_v43 }
 0x1ef   :  { %674 = vmatpush2.msra.mxu0 %v579_v53  ;;  %808 = vmatpush2.msra.mxu1 %v737_v50  ;;  %v734_v53 = vld [vmem:[#allocation4 + $0x768] sm:$0xff] }
 0x1f0   :  { %675 = vmatprep.subr.mxu0 %v578_v54  ;;  %809 = vmatprep.subr.mxu1 %v736_v51  ;;  %v733_v54 = vld [vmem:[#allocation4 + $0x760] sm:$0xff]  ;;  %v853_v51 = vand.u32 127, %v58_v7 }
 0x1f1   :  { %676 = vmatpush2.msra.mxu0 %v577_v56  ;;  %810 = vmatpush2.msra.mxu1 %v735_v52  ;;  %v731_v56 = vld [vmem:[#allocation4 + $0x750] sm:$0xff] }
 0x1f2   :  { %677 = vmatprep.subr.mxu0 %v576_v57  ;;  %811 = vmatprep.subr.mxu1 %v734_v53  ;;  %v730_v57 = vld [vmem:[#allocation4 + $0x748] sm:$0xff]  ;;  %vm855_vm1 = vcmp.eq.s32.totalorder %v853_v51, 1  ;;  %vm854_vm2 = vcmp.eq.s32.totalorder %v853_v51, 0 }
 0x1f3   :  { %678 = vmatpush2.msra.mxu0 %v575_v58  ;;  %812 = vmatpush2.msra.mxu1 %v733_v54  ;;  %v729_v58 = vld [vmem:[#allocation4 + $0x740] sm:$0xff] }
 0x1f4   :  { %680 = vmatmul.mubr.f32.vlgmr.msra.gmra.mxu0 %v540_v59  ;;  %813 = vmatprep.subr.mxu1 %v732_v55  ;;  %v728_v59 = vld [vmem:[#allocation4 + $0x738] sm:$0xff] }
 0x1f5   :  { %814 = vmatpush2.msra.mxu1 %v731_v56  ;;  %883 = vset.pattern.permute.xlu1 %v934_v42 }
 0x1f6   :  { %815 = vmatprep.subr.mxu1 %v730_v57  ;;  %884 = vset.pattern.permute.xlu0 %v934_v42 }
 0x1f7   :  { %816 = vmatpush2.msra.mxu1 %v729_v58 }
 0x1f8   :  { %817 = vmatprep.subr.mxu1 %v728_v59 }
 0x1f9   :  { %818 = vmatpush2.msra.mxu1 %v727_v9 }
 0x1fa   :  { %819 = vmatprep.subr.mxu1 %v726_v60 }
 0x1fb   :  { %820 = vmatpush2.msra.mxu1 %v725_v61 }
 0x1fc   :  { %821 = vmatprep.subr.mxu1 %v724_v62 }
 0x1fd   :  { %822 = vmatpush2.msra.mxu1 %v723_v63 }
 0x1fe   :  { %823 = vmatprep.subr.mxu1 %v722_v48 }
 0x1ff   :  { %824 = vmatpush2.msra.mxu1 %v721_v1 }
 0x274   :  { %v427_v6 = vpop.f32.mrf.mxu0 }
 0x275   :  { %v428_v12 = vadd.f32 %v427_v6, %v356_v3 }
 0x276   :  { %v429_v13 = vpop.f32.mrf.mxu0 }
 0x277   :  { %v432_v15 = vmax.f32 %v428_v12, 0.0  ;;  %v430_v17 = vadd.f32 %v429_v13, %v360_v5 }
 0x279   :  { %v433_v19 = vmax.f32 %v430_v17, 0.0  ;;  %v442_v20 = vmul.f32 %v437_v16, %v432_v15 }
 0x27b   :  { %v443_v21 = vmul.f32 %v441_v18, %v433_v19 }
 0x27d   :  { %v444_v22 = vadd.f32 %v443_v21, %v442_v20 }
 0x2b4   :  { %v681_v25 = vpop.f32.mrf.mxu0 }
 0x2b5   :  { %v682_v26 = vadd.f32 %v681_v25, %v610_v23 }
 0x2b6   :  { %v683_v27 = vpop.f32.mrf.mxu0 }
 0x2b7   :  { %v684_v28 = vadd.f32 %v683_v27, %v614_v24  ;;  %v686_v30 = vmax.f32 %v682_v26, 0.0 }
 0x2b9   :  { %v687_v29 = vmax.f32 %v684_v28, 0.0 }
 0x2bb   :  { %825 = vmatprep.mubr.f32.mxu1 %v687_v29 }
 0x2bc   :  { %826 = vmatmul.mubr.f32.vlgmr.msra.gmra.mxu1 %v686_v30 }
 0x37c   :  { %v827_v0 = vpop.f32.mrf.mxu1 }
 0x37d   :  { %v828_v32 = vadd.f32 %v827_v0, %v756_v11 }
 0x37e   :  { %v829_v33 = vpop.f32.mrf.mxu1 }
 0x37f   :  { %v832_v34 = vmax.f32 %v828_v32, 0.0  ;;  %v830_v14 = vadd.f32 %v829_v33, %v760_v31 }
 0x381   :  { %v833_v37 = vmax.f32 %v830_v14, 0.0  ;;  %v842_v38 = vmul.f32 %v837_v36, %v832_v34 }
 0x383   :  { %v843_v39 = vmul.f32 %v841_v35, %v833_v37 }
 0x385   :  { %v844_v40 = vadd.f32 %v843_v39, %v842_v38 }
 0x387   :  { %845 = vadd.xlane.f32.xlu0 %v844_v40 }
 0x38b   :  { %445 = vadd.xlane.f32.xlu0 %v444_v22 }
 0x410   :  { %v846_v46 = vpop.xlane.xlu0 %845 }
 0x411   :  { %v851_v47 = vadd.f32 %v850_v44, %v846_v46 }
 0x413   :  { %858 = vperm.xlu1 %883, %v851_v47  }
 0x414   :  { %v446_v50 = vpop.xlane.xlu0 %445 }
 0x415   :  { %v451_v41 = vadd.f32 %v450_v49, %v446_v50 }
 0x417   :  { %864 = vperm.xlu1 %883, %v451_v41  }
 0x48e   :  { %v859_v52 = vpop.permute.xlu1 %858 }
 0x48f   :  { %v861_v53 = vsel %vm855_vm1, %v859_v52, 0.0 }
 0x492   :  { %v865_v54 = vpop.permute.xlu1 %864 }
 0x493   :  { %v867_v55 = vsel %vm854_vm2, %v865_v54, %v861_v53 }
 0x494   :  { %868 = vst [vmem:[%s1046_s4] sm:$0xff] %v867_v55 }
 0x495   :  { %873 = vsyncpa [#allocation3], 1 }
 0x496   :  { %874 = vsyncpa [#allocation5], 1 }

</bundles_post_ra>
